<compile_context>
chip_gen: v5e
topology: v5e:2x2
jax: 0.10.0
libtpu: 0.0.40
codegen_flags: <defaults>
</compile_context>

<pallas_src>
import functools

import jax
import jax.numpy as jnp
from jax.experimental import pallas as pl
from jax.experimental.pallas import tpu as pltpu

M_VOCAB, D_VOCAB, H_VOCAB = 13, 32, 24
COMBINED_VOCAB = 128                       # 69 real rows, padded to a full lane tile
_OFFSETS = (0, M_VOCAB, M_VOCAB + D_VOCAB)  # month / day / hour row offsets


def _round_up(x, m):
    return -(-x // m) * m


def _temp_embed_kernel(idx_ref, tbl_ref, o_ref):
    """One grid step: TR lane-dense output rows, each packing `tpr` tokens.

    idx_ref : (TR, 3*tpr) int32  combined-vocab indices; column 3*j+k is field
                                 k (month/day/hour) of token j of the row.
    tbl_ref : (tpr, 128, L) f32  block-diagonal fused table; tbl_ref[j] maps the
                                 128-entry combined vocab into lanes [j*H,(j+1)*H).
    o_ref   : (TR, L) f32        lane-dense output slab (L = tpr * H).
    """
    tr = o_ref.shape[0]
    tpr = tbl_ref.shape[0]
    vocab = tbl_ref.shape[1]

    ids = idx_ref[...]                                             # (TR, 3*tpr)
    # Single shared iota, hoisted out of all lookup loops.
    iota = jax.lax.broadcasted_iota(jnp.int32, (tr, vocab), 1)     # (TR, 128)

    acc = None
    for j in range(tpr):
        # month / day / hour live in disjoint vocab segments -> OR == sum.
        hit = (ids[:, 3 * j:3 * j + 1] == iota)
        hit = hit | (ids[:, 3 * j + 1:3 * j + 2] == iota)
        hit = hit | (ids[:, 3 * j + 2:3 * j + 3] == iota)
        part = jnp.dot(hit.astype(jnp.float32), tbl_ref[j],
                       preferred_element_type=jnp.float32)          # (TR, L)
        acc = part if acc is None else acc + part
    o_ref[...] = acc.astype(o_ref.dtype)


@functools.partial(jax.jit, static_argnames=("tile_n",))
def temp_embed(x, m_emb, d_emb, h_emb, *, tile_n=512):
    """x: (..., 3) integer indices [month, day, hour] -> (..., H) float32."""
    batch_shape = x.shape[:-1]
    hidden = m_emb.shape[-1]

    # ---- fused table: rows 0:13 month, 13:45 day, 45:69 hour, rest zero ----
    table = jnp.concatenate(
        [m_emb, d_emb, h_emb,
         jnp.zeros((COMBINED_VOCAB - (M_VOCAB + D_VOCAB + H_VOCAB), hidden),
                   jnp.float32)], axis=0).astype(jnp.float32)       # (128, H)

    # ---- lane packing factor: tpr tokens per 128-lane output row ----
    tpr = COMBINED_VOCAB // hidden if COMBINED_VOCAB % hidden == 0 else 1
    out_lanes = tpr * hidden

    if tpr > 1:
        # Block-diagonal fused table: tbl[j] places the embedding of packed
        # token j at output lanes [j*H, (j+1)*H).
        tbl = jnp.kron(jnp.eye(tpr, dtype=jnp.float32), table)
        tbl = tbl.reshape(tpr, COMBINED_VOCAB, out_lanes)
    else:
        tbl = table[None]                                           # (1, 128, H)

    # ---- flatten tokens + apply combined-vocab offsets ----
    idx = x.reshape(-1, 3).astype(jnp.int32)
    idx = idx + jnp.array(_OFFSETS, dtype=jnp.int32)
    n = idx.shape[0]

    # ---- tile sizing ----
    tile_unit = 8 * tpr                      # keeps TR a multiple of 8 (f32 sublanes)
    tile_n = _round_up(max(tile_n, tile_unit), tile_unit)
    # Keep grid >= 2 when the problem allows it, so v7x's two TensorCores both
    # take grid steps on the "parallel" axis.
    tile_n = min(tile_n, max(tile_unit, _round_up(-(-max(n, 1) // 2), tile_unit)))

    # Stay well under the scoped VMEM default on every generation
    # (v5e default ~16 MiB scoped; v7x has only 64 MiB physical).
    def _vmem_bytes(t):
        tr_ = t // tpr
        return 4 * (2 * tr_ * COMBINED_VOCAB        # double-buffered idx block
                    + 2 * tr_ * out_lanes           # double-buffered out block
                    + 2 * tpr * COMBINED_VOCAB * out_lanes)  # resident table
    while tile_n > tile_unit and _vmem_bytes(tile_n) > 12 * 1024 * 1024:
        tile_n = max(tile_unit, _round_up(tile_n // 2, tile_unit))

    n_total = _round_up(max(n, 1), tile_n)
    if n_total != n:
        idx = jnp.pad(idx, ((0, n_total - n), (0, 0)))
    grid = (n_total // tile_n,)

    tr = tile_n // tpr              # output rows per grid step
    n_rows = n_total // tpr         # total output rows
    idx2d = idx.reshape(n_rows, 3 * tpr)   # free reshape; col 3*j+k = token j, field k

    out = pl.pallas_call(
        _temp_embed_kernel,
        out_shape=jax.ShapeDtypeStruct((n_rows, out_lanes), jnp.float32),
        grid_spec=pltpu.PrefetchScalarGridSpec(
            num_scalar_prefetch=0,
            grid=grid,
            in_specs=[
                pl.BlockSpec((tr, 3 * tpr), lambda i: (i, 0)),
                pl.BlockSpec((tpr, COMBINED_VOCAB, out_lanes),
                             lambda i: (0, 0, 0)),
            ],
            out_specs=pl.BlockSpec((tr, out_lanes), lambda i: (i, 0)),
        ),
        compiler_params=pltpu.CompilerParams(
            dimension_semantics=("parallel",)),
    )(idx2d, tbl)

    # Undo the lane packing with a free row-major reshape, drop padding rows.
    out = out.reshape(n_total, hidden)[:n]
    return out.reshape(*batch_shape, hidden)


if __name__ == "__main__":
    key = jax.random.PRNGKey(0)
    k_m, k_d, k_h, k_mi, k_di, k_hi = jax.random.split(key, 6)

    hidden = 32
    batch, seq = 2, 8

    # nn.Embedding default init: N(0, 1)
    m_emb = jax.random.normal(k_m, (M_VOCAB, hidden), dtype=jnp.float32)
    d_emb = jax.random.normal(k_d, (D_VOCAB, hidden), dtype=jnp.float32)
    h_emb = jax.random.normal(k_h, (H_VOCAB, hidden), dtype=jnp.float32)

    # Temporal indices: month [0,13), day [0,32), hour [0,24)
    mi = jax.random.randint(k_mi, (batch, seq, 1), 0, M_VOCAB, dtype=jnp.int32)
    di = jax.random.randint(k_di, (batch, seq, 1), 0, D_VOCAB, dtype=jnp.int32)
    hi = jax.random.randint(k_hi, (batch, seq, 1), 0, H_VOCAB, dtype=jnp.int32)
    x = jnp.concatenate([mi, di, hi], axis=-1)  # (batch, seq, 3)

    out = temp_embed(x, m_emb, d_emb, h_emb)
    out = jax.block_until_ready(out)

    # Pure-JAX reference check.
    ref = h_emb[x[..., 2]] + m_emb[x[..., 0]] + d_emb[x[..., 1]]
    assert out.shape == (batch, seq, hidden)
    assert jnp.allclose(out, ref, atol=1e-5, rtol=1e-5)

    print("KERNEL_OK")
</pallas_src>

<mosaic_0001>
module attributes {stable_mosaic.version = 11 : i64} {
  func.func @_temp_embed_kernel(%arg0: i32, %arg1: memref<8x12xi32, #tpu.memory_space<vmem>>, %arg2: memref<4x128x128xf32, #tpu.memory_space<vmem>>, %arg3: memref<8x128xf32, #tpu.memory_space<vmem>>) attributes {dimension_semantics = [#tpu.dimension_semantics<parallel>], iteration_bounds = array<i64: 1>, scalar_prefetch = 0 : i64, scratch_operands = 0 : i64, tpu.core_type = #tpu.core_type<tc>, window_params = [{transform_indices = @transform_0, window_bounds = array<i64: 8, 12>}, {pipeline_mode = #tpu.pipeline_mode<synchronous>, transform_indices = @transform_1, window_bounds = array<i64: 4, 128, 128>}, {transform_indices = @transform_2, window_bounds = array<i64: 8, 128>}]} {
    %c0 = arith.constant 0 : index
    %c0_0 = arith.constant 0 : index
    %0 = vector.load %arg1[%c0, %c0_0] : memref<8x12xi32, #tpu.memory_space<vmem>>, vector<8x12xi32>
    %1 = tpu.iota {dimensions = array<i32: 1>} : vector<8x128xi32>
    %2 = vector.extract_strided_slice %0 {offsets = [0, 0], sizes = [8, 1], strides = [1, 1]} : vector<8x12xi32> to vector<8x1xi32>
    %3 = vector.broadcast %2 : vector<8x1xi32> to vector<8x128xi32>
    %4 = arith.cmpi eq, %3, %1 : vector<8x128xi32>
    %5 = vector.extract_strided_slice %0 {offsets = [0, 1], sizes = [8, 1], strides = [1, 1]} : vector<8x12xi32> to vector<8x1xi32>
    %6 = vector.broadcast %5 : vector<8x1xi32> to vector<8x128xi32>
    %7 = arith.cmpi eq, %6, %1 : vector<8x128xi32>
    %8 = arith.ori %4, %7 : vector<8x128xi1>
    %9 = vector.extract_strided_slice %0 {offsets = [0, 2], sizes = [8, 1], strides = [1, 1]} : vector<8x12xi32> to vector<8x1xi32>
    %10 = vector.broadcast %9 : vector<8x1xi32> to vector<8x128xi32>
    %11 = arith.cmpi eq, %10, %1 : vector<8x128xi32>
    %12 = arith.ori %8, %11 : vector<8x128xi1>
    %13 = arith.extui %12 : vector<8x128xi1> to vector<8x128xi32>
    %14 = arith.sitofp %13 : vector<8x128xi32> to vector<8x128xf32>
    %c0_1 = arith.constant 0 : index
    %c0_2 = arith.constant 0 : index
    %c0_3 = arith.constant 0 : index
    %15 = vector.load %arg2[%c0_1, %c0_2, %c0_3] : memref<4x128x128xf32, #tpu.memory_space<vmem>>, vector<1x128x128xf32>
    %16 = vector.shape_cast %15 : vector<1x128x128xf32> to vector<128x128xf32>
    %cst = arith.constant dense<0.000000e+00> : vector<8x128xf32>
    %17 = tpu.matmul %14, %16, %cst {dimension_numbers = #tpu.dot_dimension_numbers<[1], [0], [0], [1], [0, 0, 1, 1], [], []>} : vector<8x128xf32>, vector<128x128xf32>, vector<8x128xf32> -> vector<8x128xf32>
    %18 = vector.extract_strided_slice %0 {offsets = [0, 3], sizes = [8, 1], strides = [1, 1]} : vector<8x12xi32> to vector<8x1xi32>
    %19 = vector.broadcast %18 : vector<8x1xi32> to vector<8x128xi32>
    %20 = arith.cmpi eq, %19, %1 : vector<8x128xi32>
    %21 = vector.extract_strided_slice %0 {offsets = [0, 4], sizes = [8, 1], strides = [1, 1]} : vector<8x12xi32> to vector<8x1xi32>
    %22 = vector.broadcast %21 : vector<8x1xi32> to vector<8x128xi32>
    %23 = arith.cmpi eq, %22, %1 : vector<8x128xi32>
    %24 = arith.ori %20, %23 : vector<8x128xi1>
    %25 = vector.extract_strided_slice %0 {offsets = [0, 5], sizes = [8, 1], strides = [1, 1]} : vector<8x12xi32> to vector<8x1xi32>
    %26 = vector.broadcast %25 : vector<8x1xi32> to vector<8x128xi32>
    %27 = arith.cmpi eq, %26, %1 : vector<8x128xi32>
    %28 = arith.ori %24, %27 : vector<8x128xi1>
    %29 = arith.extui %28 : vector<8x128xi1> to vector<8x128xi32>
    %30 = arith.sitofp %29 : vector<8x128xi32> to vector<8x128xf32>
    %c1 = arith.constant 1 : index
    %c0_4 = arith.constant 0 : index
    %c0_5 = arith.constant 0 : index
    %31 = vector.load %arg2[%c1, %c0_4, %c0_5] : memref<4x128x128xf32, #tpu.memory_space<vmem>>, vector<1x128x128xf32>
    %32 = vector.shape_cast %31 : vector<1x128x128xf32> to vector<128x128xf32>
    %cst_6 = arith.constant dense<0.000000e+00> : vector<8x128xf32>
    %33 = tpu.matmul %30, %32, %cst_6 {dimension_numbers = #tpu.dot_dimension_numbers<[1], [0], [0], [1], [0, 0, 1, 1], [], []>} : vector<8x128xf32>, vector<128x128xf32>, vector<8x128xf32> -> vector<8x128xf32>
    %34 = arith.addf %17, %33 : vector<8x128xf32>
    %35 = vector.extract_strided_slice %0 {offsets = [0, 6], sizes = [8, 1], strides = [1, 1]} : vector<8x12xi32> to vector<8x1xi32>
    %36 = vector.broadcast %35 : vector<8x1xi32> to vector<8x128xi32>
    %37 = arith.cmpi eq, %36, %1 : vector<8x128xi32>
    %38 = vector.extract_strided_slice %0 {offsets = [0, 7], sizes = [8, 1], strides = [1, 1]} : vector<8x12xi32> to vector<8x1xi32>
    %39 = vector.broadcast %38 : vector<8x1xi32> to vector<8x128xi32>
    %40 = arith.cmpi eq, %39, %1 : vector<8x128xi32>
    %41 = arith.ori %37, %40 : vector<8x128xi1>
    %42 = vector.extract_strided_slice %0 {offsets = [0, 8], sizes = [8, 1], strides = [1, 1]} : vector<8x12xi32> to vector<8x1xi32>
    %43 = vector.broadcast %42 : vector<8x1xi32> to vector<8x128xi32>
    %44 = arith.cmpi eq, %43, %1 : vector<8x128xi32>
    %45 = arith.ori %41, %44 : vector<8x128xi1>
    %46 = arith.extui %45 : vector<8x128xi1> to vector<8x128xi32>
    %47 = arith.sitofp %46 : vector<8x128xi32> to vector<8x128xf32>
    %c2 = arith.constant 2 : index
    %c0_7 = arith.constant 0 : index
    %c0_8 = arith.constant 0 : index
    %48 = vector.load %arg2[%c2, %c0_7, %c0_8] : memref<4x128x128xf32, #tpu.memory_space<vmem>>, vector<1x128x128xf32>
    %49 = vector.shape_cast %48 : vector<1x128x128xf32> to vector<128x128xf32>
    %cst_9 = arith.constant dense<0.000000e+00> : vector<8x128xf32>
    %50 = tpu.matmul %47, %49, %cst_9 {dimension_numbers = #tpu.dot_dimension_numbers<[1], [0], [0], [1], [0, 0, 1, 1], [], []>} : vector<8x128xf32>, vector<128x128xf32>, vector<8x128xf32> -> vector<8x128xf32>
    %51 = arith.addf %34, %50 : vector<8x128xf32>
    %52 = vector.extract_strided_slice %0 {offsets = [0, 9], sizes = [8, 1], strides = [1, 1]} : vector<8x12xi32> to vector<8x1xi32>
    %53 = vector.broadcast %52 : vector<8x1xi32> to vector<8x128xi32>
    %54 = arith.cmpi eq, %53, %1 : vector<8x128xi32>
    %55 = vector.extract_strided_slice %0 {offsets = [0, 10], sizes = [8, 1], strides = [1, 1]} : vector<8x12xi32> to vector<8x1xi32>
    %56 = vector.broadcast %55 : vector<8x1xi32> to vector<8x128xi32>
    %57 = arith.cmpi eq, %56, %1 : vector<8x128xi32>
    %58 = arith.ori %54, %57 : vector<8x128xi1>
    %59 = vector.extract_strided_slice %0 {offsets = [0, 11], sizes = [8, 1], strides = [1, 1]} : vector<8x12xi32> to vector<8x1xi32>
    %60 = vector.broadcast %59 : vector<8x1xi32> to vector<8x128xi32>
    %61 = arith.cmpi eq, %60, %1 : vector<8x128xi32>
    %62 = arith.ori %58, %61 : vector<8x128xi1>
    %63 = arith.extui %62 : vector<8x128xi1> to vector<8x128xi32>
    %64 = arith.sitofp %63 : vector<8x128xi32> to vector<8x128xf32>
    %c3 = arith.constant 3 : index
    %c0_10 = arith.constant 0 : index
    %c0_11 = arith.constant 0 : index
    %65 = vector.load %arg2[%c3, %c0_10, %c0_11] : memref<4x128x128xf32, #tpu.memory_space<vmem>>, vector<1x128x128xf32>
    %66 = vector.shape_cast %65 : vector<1x128x128xf32> to vector<128x128xf32>
    %cst_12 = arith.constant dense<0.000000e+00> : vector<8x128xf32>
    %67 = tpu.matmul %64, %66, %cst_12 {dimension_numbers = #tpu.dot_dimension_numbers<[1], [0], [0], [1], [0, 0, 1, 1], [], []>} : vector<8x128xf32>, vector<128x128xf32>, vector<8x128xf32> -> vector<8x128xf32>
    %68 = arith.addf %51, %67 : vector<8x128xf32>
    %c0_13 = arith.constant 0 : index
    %c0_14 = arith.constant 0 : index
    %69 = vector.load %arg3[%c0_13, %c0_14] : memref<8x128xf32, #tpu.memory_space<vmem>>, vector<8x128xf32>
    tpu.vector_store %arg3[%c0_13, %c0_14], %68 {strides = array<i32>} : memref<8x128xf32, #tpu.memory_space<vmem>>, vector<8x128xf32>,
    return
  }
  func.func @transform_0(%arg0: i32) -> (i32, i32) {
    %c0_i32 = arith.constant 0 : i32
    %c0_i32_0 = arith.constant 0 : i32
    return %arg0, %c0_i32 : i32, i32
  }
  func.func @transform_1(%arg0: i32) -> (i32, i32, i32) {
    %c0_i32 = arith.constant 0 : i32
    %c0_i32_0 = arith.constant 0 : i32
    %c0_i32_1 = arith.constant 0 : i32
    %c0_i32_2 = arith.constant 0 : i32
    return %c0_i32, %c0_i32_0, %c0_i32_1 : i32, i32, i32
  }
  func.func @transform_2(%arg0: i32) -> (i32, i32) {
    %c0_i32 = arith.constant 0 : i32
    %c0_i32_0 = arith.constant 0 : i32
    return %arg0, %c0_i32 : i32, i32
  }
}

</mosaic_0001>

<bundles_post_ra>
// kernel: temp_embed.1
= control target key start
LH: loop header
LB: loop body
LE: loop exit
PB: predicated region body
PF: predicated region fallthrough
CT: control target
= control target key end

     0   :  { %v314_v0 = vmov 8   ;;  %v315_v1 = vmov 6   ;;  %v316_v3 = vmov 10   ;;  %v317_v9 = vmov 9   ;;  %s554_s0 = inlined_call_operand.vmem [shape: s32[8,12], index: 0, kind: input, shape index: {}]   ;;  %s555_s1 = inlined_call_operand.vmem [shape: f32[4,128,128], index: 1, kind: input, shape index: {}]   ;;  %s556_s2 = inlined_call_operand.vmem [shape: f32[8,128], index: 2, kind: output, shape index: {}]  }
   0x1   :  { %303 = vset.pattern.permute.xlu1 %v314_v0  ;;  %301 = vset.pattern.permute.xlu0 %v315_v1  ;;  %v345_v2 = vld [vmem:[%s554_s0] sm:$0xff]  ;;  %v268_v4 = vld [vmem:[%s555_s1 + $0x178] sm:$0xff]  ;;  %v267_v6 = vld [vmem:[%s555_s1 + $0x170] sm:$0xff]  ;;  %v318_v10 = vmov 7   ;;  %v319_v14 = vmov 11   ;;  %v320_v22 = vmov 0  }
   0x2   :  { %129 = vperm.xlu1 %303, %v345_v2   ;;  %120 = vperm.xlu0 %301, %v345_v2   ;;  %v286_v5 = vld [vmem:[%s555_s1 + $0x1f8] sm:$0xff]  ;;  %v285_v7 = vld [vmem:[%s555_s1 + $0x1f0] sm:$0xff]  ;;  %v266_v8 = vld [vmem:[%s555_s1 + $0x168] sm:$0xff]  ;;  %v321_v23 = vmov 3   ;;  %v322_v26 = vmov 1   ;;  %v323_v27 = vmov 4  }
   0x3   :  { %305 = vset.pattern.permute.xlu2 %v316_v3  ;;  %152 = vmatpush.msra.mxu2 %v268_v4  ;;  %v284_v11 = vld [vmem:[%s555_s1 + $0x1e8] sm:$0xff]  ;;  %v265_v12 = vld [vmem:[%s555_s1 + $0x160] sm:$0xff]  ;;  %v45_v13 = vld [vmem:[%s555_s1 + $0x78] sm:$0xff]  ;;  %v324_v28 = vmov 2   ;;  %v325_v29 = vmov 5  }
   0x4   :  { %178 = vperm.xlu2 %305, %v345_v2   ;;  %206 = vmatpush.msra.mxu3 %v286_v5  ;;  %v283_v15 = vld [vmem:[%s555_s1 + $0x1e0] sm:$0xff]  ;;  %v264_v16 = vld [vmem:[%s555_s1 + $0x158] sm:$0xff]  ;;  %v44_v17 = vld [vmem:[%s555_s1 + $0x70] sm:$0xff] }
   0x5   :  { %153 = vmatpush.msra.mxu2 %v267_v6  ;;  %v282_v18 = vld [vmem:[%s555_s1 + $0x1d8] sm:$0xff]  ;;  %99 = vmatpush.msra.mxu1 %v45_v13  ;;  %v263_v19 = vld [vmem:[%s555_s1 + $0x150] sm:$0xff]  ;;  %v43_v20 = vld [vmem:[%s555_s1 + $0x68] sm:$0xff] }
   0x6   :  { %207 = vmatpush.msra.mxu3 %v285_v7  ;;  %v281_v21 = vld [vmem:[%s555_s1 + $0x1d0] sm:$0xff]  ;;  %v262_v24 = vld [vmem:[%s555_s1 + $0x148] sm:$0xff]  ;;  %v261_v30 = vld [vmem:[%s555_s1 + $0x140] sm:$0xff] }
   0x7   :  { %154 = vmatpush.msra.mxu2 %v266_v8  ;;  %100 = vmatpush.msra.mxu1 %v44_v17  ;;  %v280_v25 = vld [vmem:[%s555_s1 + $0x1c8] sm:$0xff]  ;;  %v279_v31 = vld [vmem:[%s555_s1 + $0x1c0] sm:$0xff]  ;;  %v260_v33 = vld [vmem:[%s555_s1 + $0x138] sm:$0xff] }
   0x8   :  { %208 = vmatpush.msra.mxu3 %v284_v11  ;;  %v42_v32 = vld [vmem:[%s555_s1 + $0x60] sm:$0xff]  ;;  %v278_v34 = vld [vmem:[%s555_s1 + $0x1b8] sm:$0xff]  ;;  %v259_v36 = vld [vmem:[%s555_s1 + $0x130] sm:$0xff] }
   0x9   :  { %155 = vmatpush.msra.mxu2 %v265_v12  ;;  %101 = vmatpush.msra.mxu1 %v43_v20  ;;  %v41_v35 = vld [vmem:[%s555_s1 + $0x58] sm:$0xff]  ;;  %v277_v37 = vld [vmem:[%s555_s1 + $0x1b0] sm:$0xff]  ;;  %v258_v39 = vld [vmem:[%s555_s1 + $0x128] sm:$0xff] }
   0xa   :  { %304 = vset.pattern.permute.xlu1 %v317_v9  ;;  %302 = vset.pattern.permute.xlu0 %v318_v10  ;;  %v40_v38 = vld [vmem:[%s555_s1 + $0x50] sm:$0xff]  ;;  %v276_v40 = vld [vmem:[%s555_s1 + $0x1a8] sm:$0xff]  ;;  %v257_v42 = vld [vmem:[%s555_s1 + $0x120] sm:$0xff] }
   0xb   :  { %174 = vperm.xlu1 %304, %v345_v2   ;;  %124 = vperm.xlu0 %302, %v345_v2   ;;  %v39_v41 = vld [vmem:[%s555_s1 + $0x48] sm:$0xff]  ;;  %v275_v43 = vld [vmem:[%s555_s1 + $0x1a0] sm:$0xff]  ;;  %v256_v45 = vld [vmem:[%s555_s1 + $0x118] sm:$0xff] }
   0xc   :  { %306 = vset.pattern.permute.xlu2 %v319_v14  ;;  %209 = vmatpush.msra.mxu3 %v283_v15  ;;  %v38_v44 = vld [vmem:[%s555_s1 + $0x40] sm:$0xff]  ;;  %v274_v46 = vld [vmem:[%s555_s1 + $0x198] sm:$0xff]  ;;  %v255_v49 = vld [vmem:[%s555_s1 + $0x110] sm:$0xff]  ;;  %v12_v15 = vlaneseq }
   0xd   :  { %183 = vperm.xlu2 %306, %v345_v2   ;;  %156 = vmatpush.msra.mxu2 %v264_v16  ;;  %v37_v47 = vld [vmem:[%s555_s1 + $0x38] sm:$0xff]  ;;  %v273_v50 = vld [vmem:[%s555_s1 + $0x190] sm:$0xff]  ;;  %v254_v53 = vld [vmem:[%s555_s1 + $0x108] sm:$0xff] }
   0xe   :  { %210 = vmatpush.msra.mxu3 %v282_v18  ;;  %102 = vmatpush.msra.mxu1 %v42_v32  ;;  %v249_v48 = vld [vmem:[%s555_s1 + $0xf8] sm:$0xff]  ;;  %v36_v51 = vld [vmem:[%s555_s1 + $0x30] sm:$0xff]  ;;  %v272_v54 = vld [vmem:[%s555_s1 + $0x188] sm:$0xff]  ;;  %v13_v18 = vand.u32 127, %v12_v15 }
   0xf   :  { %157 = vmatpush.msra.mxu2 %v263_v19  ;;  %79 = vmatpush.msra.mxu0 %v249_v48  ;;  %v248_v52 = vld [vmem:[%s555_s1 + $0xf0] sm:$0xff]  ;;  %v35_v55 = vld [vmem:[%s555_s1 + $0x28] sm:$0xff]  ;;  %v253_v57 = vld [vmem:[%s555_s1 + $0x100] sm:$0xff] }
  0x10   :  { %211 = vmatpush.msra.mxu3 %v281_v21  ;;  %103 = vmatpush.msra.mxu1 %v41_v35  ;;  %v247_v56 = vld [vmem:[%s555_s1 + $0xe8] sm:$0xff]  ;;  %v271_v58 = vld [vmem:[%s555_s1 + $0x180] sm:$0xff]  ;;  %v33_v61 = vld [vmem:[%s555_s1 + $0x18] sm:$0xff] }
  0x11   :  { %158 = vmatpush.msra.mxu2 %v262_v24  ;;  %80 = vmatpush.msra.mxu0 %v248_v52  ;;  %v34_v59 = vld [vmem:[%s555_s1 + $0x20] sm:$0xff]  ;;  %v245_v62 = vld [vmem:[%s555_s1 + $0xd8] sm:$0xff]  ;;  %v32_v63 = vld [vmem:[%s555_s1 + $0x10] sm:$0xff] }
  0x12   :  { %212 = vmatpush.msra.mxu3 %v280_v25  ;;  %104 = vmatpush.msra.mxu1 %v40_v38  ;;  %v246_v60 = vld [vmem:[%s555_s1 + $0xe0] sm:$0xff]  ;;  %v244_v1 = vld [vmem:[%s555_s1 + $0xd0] sm:$0xff]  ;;  %v243_v3 = vld [vmem:[%s555_s1 + $0xc8] sm:$0xff] }
  0x13   :  { %307 = vset.pattern.permute.xlu1 %v320_v22  ;;  %309 = vset.pattern.permute.xlu0 %v321_v23  ;;  %v30_v4 = vld [vmem:[%s555_s1] sm:$0xff]  ;;  %v241_v6 = vld [vmem:[%s555_s1 + $0xb8] sm:$0xff]  ;;  %v240_v7 = vld [vmem:[%s555_s1 + $0xb0] sm:$0xff]  ;;  %v326_v22 = vmov 1.0  }
  0x14   :  { %15 = vperm.xlu1 %307, %v345_v2   ;;  %47 = vperm.xlu0 %309, %v345_v2   ;;  %v242_v5 = vld [vmem:[%s555_s1 + $0xc0] sm:$0xff]  ;;  %v239_v9 = vld [vmem:[%s555_s1 + $0xa8] sm:$0xff]  ;;  %v237_v11 = vld [vmem:[%s555_s1 + $0x98] sm:$0xff] }
  0x15   :  { %308 = vset.pattern.permute.xlu2 %v322_v26  ;;  %159 = vmatpush.msra.mxu2 %v261_v30  ;;  %v238_v10 = vld [vmem:[%s555_s1 + $0xa0] sm:$0xff]  ;;  %v235_v16 = vld [vmem:[%s555_s1 + $0x88] sm:$0xff] }
  0x16   :  { %19 = vperm.xlu2 %308, %v345_v2   ;;  %213 = vmatpush.msra.mxu3 %v279_v31  ;;  %v234_v19 = vld [vmem:[%s555_s1 + $0x80] sm:$0xff] }
  0x17   :  { %160 = vmatpush.msra.mxu2 %v260_v33  ;;  %105 = vmatpush.msra.mxu1 %v39_v41 }
  0x18   :  { %214 = vmatpush.msra.mxu3 %v278_v34  ;;  %81 = vmatpush.msra.mxu0 %v247_v56 }
  0x19   :  { %161 = vmatpush.msra.mxu2 %v259_v36  ;;  %106 = vmatpush.msra.mxu1 %v38_v44 }
  0x1a   :  { %215 = vmatpush.msra.mxu3 %v277_v37  ;;  %82 = vmatpush.msra.mxu0 %v246_v60 }
  0x1b   :  { %162 = vmatpush.msra.mxu2 %v258_v39  ;;  %107 = vmatpush.msra.mxu1 %v37_v47 }
  0x1c   :  { %310 = vset.pattern.permute.xlu1 %v323_v27  ;;  %313 = vset.pattern.permute.xlu0 %v319_v14  ;;  %v236_v14 = vld [vmem:[%s555_s1 + $0x90] sm:$0xff] }
  0x1d   :  { %51 = vperm.xlu1 %310, %v345_v2   ;;  %216 = vmatpush.msra.mxu3 %v276_v40 }
  0x1e   :  { %311 = vset.pattern.permute.xlu2 %v324_v28  ;;  %163 = vmatpush.msra.mxu2 %v257_v42 }
  0x1f   :  { %24 = vperm.xlu2 %311, %v345_v2   ;;  %217 = vmatpush.msra.mxu3 %v275_v43 }
  0x20   :  { %164 = vmatpush.msra.mxu2 %v256_v45  ;;  %108 = vmatpush.msra.mxu1 %v36_v51 }
  0x21   :  { %218 = vmatpush.msra.mxu3 %v274_v46  ;;  %83 = vmatpush.msra.mxu0 %v245_v62 }
  0x22   :  { %165 = vmatpush.msra.mxu2 %v255_v49  ;;  %109 = vmatpush.msra.mxu1 %v35_v55 }
  0x23   :  { %219 = vmatpush.msra.mxu3 %v273_v50  ;;  %84 = vmatpush.msra.mxu0 %v244_v1 }
  0x24   :  { %166 = vmatpush.msra.mxu2 %v254_v53  ;;  %110 = vmatpush.msra.mxu1 %v34_v59 }
  0x25   :  { %312 = vset.pattern.permute.xlu1 %v325_v29  ;;  %220 = vmatpush.msra.mxu3 %v272_v54 }
  0x26   :  { %56 = vperm.xlu1 %312, %v345_v2   ;;  %167 = vmatpush.msra.mxu2 %v253_v57  ;;  %v31_v2 = vld [vmem:[%s555_s1 + $0x8] sm:$0xff] }
  0x27   :  { %221 = vmatpush.msra.mxu3 %v271_v58  ;;  %111 = vmatpush.msra.mxu1 %v33_v61 }
  0x28   :  { %85 = vmatpush.msra.mxu0 %v243_v3 }
  0x29   :  { %112 = vmatpush.msra.mxu1 %v32_v63 }
  0x2a   :  { %86 = vmatpush.msra.mxu0 %v242_v5 }
  0x2b   :  { %113 = vmatpush.msra.mxu1 %v31_v2 }
  0x2c   :  { %87 = vmatpush.msra.mxu0 %v241_v6 }
  0x2d   :  { %114 = vmatpush.msra.mxu1 %v30_v4 }
  0x2e   :  { %88 = vmatpush.msra.mxu0 %v240_v7 }
  0x30   :  { %89 = vmatpush.msra.mxu0 %v239_v9 }
  0x32   :  { %90 = vmatpush.msra.mxu0 %v238_v10 }
  0x34   :  { %91 = vmatpush.msra.mxu0 %v237_v11 }
  0x36   :  { %92 = vmatpush.msra.mxu0 %v236_v14 }
  0x38   :  { %93 = vmatpush.msra.mxu0 %v235_v16 }
  0x3a   :  { %94 = vmatpush.msra.mxu0 %v234_v19 }
  0x5e   :  { %v179_v0 = vpop.permute.xlu2 %178 }
  0x5f   :  { %vm180_vm0 = vcmp.eq.s32.totalorder %v179_v0, %v13_v18 }
  0x67   :  { %v184_v8 = vpop.permute.xlu2 %183 }
  0x68   :  { %vm185_vm4 = vcmp.eq.s32.totalorder %v184_v8, %v13_v18 }
  0x70   :  { %v20_v17 = vpop.permute.xlu2 %19 }
  0x71   :  { %vm21_vm10 = vcmp.eq.s32.totalorder %v20_v17, %v13_v18 }
  0x74   :  { %v130_v12 = vpop.permute.xlu1 %129  ;;  %v121_v13 = vpop.permute.xlu0 %120 }
  0x75   :  { %vm122_vm1 = vcmp.eq.s32.totalorder %v121_v13, %v13_v18  ;;  %vm131_vm6 = vcmp.eq.s32.totalorder %v130_v12, %v13_v18 }
  0x79   :  { %v25_v23 = vpop.permute.xlu2 %24 }
  0x7a   :  { %vm26_vm11 = vcmp.eq.s32.totalorder %v25_v23, %v13_v18 }
  0x7d   :  { %v175_v20 = vpop.permute.xlu1 %174  ;;  %v125_v21 = vpop.permute.xlu0 %124 }
  0x7e   :  { %vm176_vm2 = vcmp.eq.s32.totalorder %v175_v20, %v13_v18  ;;  %vm126_vm3 = vcmp.eq.s32.totalorder %v125_v21, %v13_v18 }
  0x7f   :  { %vm181_vm5 = vmor %vm176_vm2, %vm180_vm0 }
  0x80   :  { %vm127_vm7 = vmor %vm122_vm1, %vm126_vm3 }
  0x81   :  { %vm132_vm8 = vmor %vm127_vm7, %vm131_vm6 }
  0x82   :  { %269 = vmatmul.msk.f32.vlgmr.msra.gmra.mxu2 %vm132_vm8, %v326_v22  ;;  %vm186_vm9 = vmor %vm181_vm5, %vm185_vm4 }
  0x83   :  { %287 = vmatmul.msk.f32.vlgmr.msra.gmra.mxu3 %vm186_vm9, %v326_v22 }
  0x86   :  { %v16_v24 = vpop.permute.xlu1 %15  ;;  %v48_v26 = vpop.permute.xlu0 %47 }
  0x87   :  { %vm17_vm12 = vcmp.eq.s32.totalorder %v16_v24, %v13_v18  ;;  %vm49_vm0 = vcmp.eq.s32.totalorder %v48_v26, %v13_v18 }
  0x88   :  { %vm22_vm13 = vmor %vm17_vm12, %vm21_vm10 }
  0x89   :  { %vm27_vm14 = vmor %vm22_vm13, %vm26_vm11 }
  0x8a   :  { %251 = vmatmul.msk.f32.vlgmr.msra.gmra.mxu1 %vm27_vm14, %v326_v22 }
  0x8f   :  { %v52_v25 = vpop.permute.xlu1 %51 }
  0x90   :  { %vm53_vm15 = vcmp.eq.s32.totalorder %v52_v25, %v13_v18 }
  0x91   :  { %vm54_vm2 = vmor %vm49_vm0, %vm53_vm15 }
  0x98   :  { %v57_v27 = vpop.permute.xlu1 %56 }
  0x99   :  { %vm58_vm1 = vcmp.eq.s32.totalorder %v57_v27, %v13_v18 }
  0x9a   :  { %vm59_vm3 = vmor %vm54_vm2, %vm58_vm1 }
  0x9b   :  { %250 = vmatmul.msk.f32.vlgmr.msra.gmra.mxu0 %vm59_vm3, %v326_v22 }
 0x105   :  { %v169_v31 = vpop.f32.mrf.mxu2 }
 0x106   :  { %v223_v33 = vpop.f32.mrf.mxu3 }
 0x107   :  { %v116_v28 = vpop.f32.mrf.mxu1 }
 0x118   :  { %v96_v29 = vpop.f32.mrf.mxu0 }
 0x119   :  { %v117_v30 = vadd.f32 %v116_v28, %v96_v29 }
 0x11b   :  { %v172_v32 = vadd.f32 %v169_v31, %v117_v30 }
 0x11d   :  { %v226_v34 = vadd.f32 %v223_v33, %v172_v32 }
 0x11f   :  { %227 = vst [vmem:[%s556_s2] sm:$0xff] %v226_v34 }

</bundles_post_ra>
